<compile_context>
chip_gen: v5e
topology: v5e:2x2
jax: 0.10.0
libtpu: 0.0.40
codegen_flags: <defaults>
</compile_context>

<pallas_src>
import jax
import jax.numpy as jnp
from jax.experimental import pallas as pl
from jax.experimental.pallas import tpu as pltpu


def gnn_kernel(s_ref, x_ref, o_ref):
    # s_ref: (N, N)    bf16  precomputed 2 * A_pow * theta1 (weight-only)
    # x_ref: (N, B*T)  f32   activations, batch folded into lanes
    # o_ref: (N, B*T)  f32
    x = x_ref[...]
    out = jnp.dot(
        s_ref[...],
        x.astype(jnp.bfloat16),
        preferred_element_type=jnp.float32,
    )
    o_ref[...] = out + x  # residual in f32


def double_gnn_forward(a_pow, theta1, theta2, inputs):
    """Forward of double_GNN.

    a_pow:  (N, N) or (B, N, N); the module builds A_pow once and .repeat()s it
            over the batch, so it is batch-invariant by construction and only
            one (N, N) copy is streamed through the kernel.
    theta1: (N, N).  theta2: defined by the module but unused in forward.
    inputs: (B, C, N, T); only channel 0 is used.
    """
    del theta2  # matches the PyTorch forward (theta2 never used)
    if a_pow.ndim == 3:
        # Batch-invariant by construction (module repeats a single A@A).
        a_pow = a_pow[0]

    B, _, N, T = inputs.shape
    BT = B * T
    assert N % 128 == 0 and BT % 128 == 0, "pad N / B*T to (8,128)-aligned sizes"

    # Weight-only precompute (one XLA fusion, amortized across steps in
    # training): fold the "out1 + out2 == 2x" scale into the weights before the
    # bf16 cast (doubling is exponent-only -> bit-exact vs scaling afterwards).
    support2 = (2.0 * a_pow.astype(jnp.float32) * theta1.astype(jnp.float32)).astype(
        jnp.bfloat16
    )

    # Fold batch into lanes: channel-0 slice + transpose + reshape fuse into a
    # single XLA copy producing x_t: (N, B*T)  (lane-dense RHS / output layout).
    x_t = (
        jnp.transpose(inputs[:, 0, :, :], (1, 0, 2))
        .reshape(N, BT)
        .astype(jnp.float32)
    )

    cost = pl.CostEstimate(
        flops=2 * N * N * BT,
        bytes_accessed=N * N * 2 + N * BT * 4 + N * BT * 4,
        transcendentals=0,
    )

    out_t = pl.pallas_call(
        gnn_kernel,
        out_shape=jax.ShapeDtypeStruct((N, BT), jnp.float32),
        grid_spec=pltpu.PrefetchScalarGridSpec(
            num_scalar_prefetch=0,
            grid=(1,),  # single full-height step: everything fits VMEM trivially
            in_specs=[
                pl.BlockSpec((N, N), lambda i: (0, 0)),    # support2 (bf16)
                pl.BlockSpec((N, BT), lambda i: (0, 0)),   # x_t resident (f32)
            ],
            out_specs=pl.BlockSpec((N, BT), lambda i: (0, 0)),
        ),
        compiler_params=pltpu.CompilerParams(
            dimension_semantics=("arbitrary",),
        ),
        cost_estimate=cost,
    )(support2, x_t)

    # (N, B*T) -> (B, N, T)
    return jnp.transpose(out_t.reshape(N, B, T), (1, 0, 2))


if __name__ == "__main__":
    # Small shapes consistent with the forward: (B, C, N, T).
    # B*T = 128 keeps the kernel output lane-dense.
    B, C, N, T = 8, 2, 128, 16

    key = jax.random.PRNGKey(0)
    k_a, k_t1, k_t2, k_x = jax.random.split(key, 4)

    # Deterministic synthetic adjacency (stand-in for the CSV-derived one).
    A = (jax.random.uniform(k_a, (N, N)) < 0.05).astype(jnp.float32)
    a_pow = A @ A  # A @ A, batch-invariant (module repeats it over batch)

    theta1 = jax.random.normal(k_t1, (N, N), dtype=jnp.float32)
    theta2 = jax.random.normal(k_t2, (N, N), dtype=jnp.float32)  # defined, unused
    inputs = jax.random.normal(k_x, (B, C, N, T), dtype=jnp.float32)

    out = double_gnn_forward(a_pow, theta1, theta2, inputs)
    out = jax.block_until_ready(out)
    assert out.shape == (B, N, T)

    # Pure-JAX reference.  The kernel feeds the MXU bf16 operands (support2 and
    # x) with f32 accumulation and adds the residual in f32; the reference
    # applies the same operand rounding, so the remaining difference is
    # accumulation order only.
    x = inputs[:, 0, :, :]
    support_bf = (
        (2.0 * a_pow * theta1).astype(jnp.bfloat16).astype(jnp.float32)
    )
    x_bf = x.astype(jnp.bfloat16).astype(jnp.float32)
    ref = jnp.einsum("ij,bjt->bit", support_bf, x_bf) + x
    assert jnp.allclose(out, ref, atol=1e-3, rtol=1e-3), "mismatch vs reference"

    print("KERNEL_OK")
</pallas_src>

<mosaic_0001>
module attributes {stable_mosaic.version = 11 : i64} {
  func.func @gnn_kernel(%arg0: i32, %arg1: memref<128x128xbf16, #tpu.memory_space<vmem>>, %arg2: memref<128x128xf32, #tpu.memory_space<vmem>>, %arg3: memref<128x128xf32, #tpu.memory_space<vmem>>) attributes {dimension_semantics = [#tpu.dimension_semantics<arbitrary>], iteration_bounds = array<i64: 1>, scalar_prefetch = 0 : i64, scratch_operands = 0 : i64, tpu.core_type = #tpu.core_type<tc>, window_params = [{pipeline_mode = #tpu.pipeline_mode<synchronous>, transform_indices = @transform_0, window_bounds = array<i64: 128, 128>}, {pipeline_mode = #tpu.pipeline_mode<synchronous>, transform_indices = @transform_1, window_bounds = array<i64: 128, 128>}, {pipeline_mode = #tpu.pipeline_mode<synchronous>, transform_indices = @transform_2, window_bounds = array<i64: 128, 128>}]} {
    %c0 = arith.constant 0 : index
    %c0_0 = arith.constant 0 : index
    %0 = vector.load %arg2[%c0, %c0_0] : memref<128x128xf32, #tpu.memory_space<vmem>>, vector<128x128xf32>
    %c0_1 = arith.constant 0 : index
    %c0_2 = arith.constant 0 : index
    %1 = vector.load %arg1[%c0_1, %c0_2] : memref<128x128xbf16, #tpu.memory_space<vmem>>, vector<128x128xbf16>
    %2 = arith.truncf %0 : vector<128x128xf32> to vector<128x128xbf16>
    %cst = arith.constant dense<0.000000e+00> : vector<128x128xf32>
    %3 = tpu.matmul %1, %2, %cst {dimension_numbers = #tpu.dot_dimension_numbers<[1], [0], [0], [1], [0, 0, 1, 1], [], []>} : vector<128x128xbf16>, vector<128x128xbf16>, vector<128x128xf32> -> vector<128x128xf32>
    %4 = arith.addf %3, %0 : vector<128x128xf32>
    %c0_3 = arith.constant 0 : index
    %c0_4 = arith.constant 0 : index
    %5 = vector.load %arg3[%c0_3, %c0_4] : memref<128x128xf32, #tpu.memory_space<vmem>>, vector<128x128xf32>
    tpu.vector_store %arg3[%c0_3, %c0_4], %4 {strides = array<i32>} : memref<128x128xf32, #tpu.memory_space<vmem>>, vector<128x128xf32>,
    return
  }
  func.func @transform_0(%arg0: i32) -> (i32, i32) {
    %c0_i32 = arith.constant 0 : i32
    %c0_i32_0 = arith.constant 0 : i32
    %c0_i32_1 = arith.constant 0 : i32
    return %c0_i32, %c0_i32_0 : i32, i32
  }
  func.func @transform_1(%arg0: i32) -> (i32, i32) {
    %c0_i32 = arith.constant 0 : i32
    %c0_i32_0 = arith.constant 0 : i32
    %c0_i32_1 = arith.constant 0 : i32
    return %c0_i32, %c0_i32_0 : i32, i32
  }
  func.func @transform_2(%arg0: i32) -> (i32, i32) {
    %c0_i32 = arith.constant 0 : i32
    %c0_i32_0 = arith.constant 0 : i32
    %c0_i32_1 = arith.constant 0 : i32
    return %c0_i32, %c0_i32_0 : i32, i32
  }
}

</mosaic_0001>

<bundles_post_ra>
// kernel: tpu_custom_call.1
= control target key start
LH: loop header
LB: loop body
LE: loop exit
PB: predicated region body
PF: predicated region fallthrough
CT: control target
= control target key end

     0   :  { %7 = vsyncpa [#allocation3], 0  ;;  %s447_s0 = inlined_call_operand.hbm [shape: bf16[128,128], index: 0, kind: input, shape index: {}]   ;;  %s448_s1 = inlined_call_operand.hbm [shape: f32[128,128], index: 1, kind: input, shape index: {}]   ;;  %s449_s2 = inlined_call_operand.hbm [shape: f32[128,128], index: 2, kind: output, shape index: {}]  }
   0x1   :  { %8 = vsyncpa [#allocation6], 0 }
   0x2   :  { %9 = vsyncpa [#allocation4], 0  ;;  %s14_s11 = sshll.u32 %s447_s0, 4  ;;  %s366_s12 = smov [#allocation2]   ;;  %s15_s11 = int_to_ptr.hbm [resolvable:$true] %s14_s11 }
   0x3   :  { %s16_s13 = sshll.u32 %s366_s12, 4  ;;  %s27_s16 = sshll.u32 %s448_s1, 4  ;;  %s17_s13 = int_to_ptr.vmem [resolvable:$true] %s16_s13  ;;  %s28_s16 = int_to_ptr.hbm [resolvable:$true] %s27_s16 }
   0x4   :  { %s367_s17 = smov 64   ;;  %s368_s18 = smov 4  }
   0x5   :  { %22 = dma.hbm_to_vmem [thread:$0]  %s15_s11, 1024, %s17_s13, [#allocation3], %s367_s17, %s367_s17, %s368_s18  }
   0x6   :  { %s369_s19 = smov [#allocation5]   ;;  %s370_s21 = smov 128  }
   0x7   :  { %s29_s20 = sshll.u32 %s369_s19, 4  ;;  %s371_s22 = smov 8   ;;  %s30_s20 = int_to_ptr.vmem [resolvable:$true] %s29_s20 }
   0x8   :  { %35 = dma.hbm_to_vmem [thread:$0]  %s28_s16, 2048, %s30_s20, [#allocation6], %s370_s21, %s370_s21, %s371_s22  }
   0x9   :  { %360 = dma.done.wait [#allocation3], 1024  }
   0xa   :  { %361 = vsyncadd [#allocation3], 4294966272 }
   0xb   :  { %362 = dma.done.wait [#allocation6], 2048  }
   0xc   :  { %363 = vsyncadd [#allocation6], 4294965248  ;;  %v397_v0 = vld [vmem:[#allocation5 + $0x70] sm:$0xff]  ;;  %v399_v1 = vld [vmem:[#allocation5 + $0x78] sm:$0xff]  ;;  %s372_s0 = smov [#allocation7]   ;;  %s203_s25 = sshll.u32 %s449_s2, 4  ;;  %s204_s25 = int_to_ptr.hbm [resolvable:$true] %s203_s25 }
   0xd   :  { %v401_v2 = vld [vmem:[#allocation5 + $0x60] sm:$0xff]  ;;  %v83_v3 = vpack.c.bf16 %v399_v1, %v397_v0  ;;  %v405_v4 = vld [vmem:[#allocation5 + $0x68] sm:$0xff]  ;;  %v409_v6 = vld [vmem:[#allocation5 + $0x50] sm:$0xff]  ;;  %s201_s1 = sshll.u32 %s372_s0, 4  ;;  %s202_s1 = int_to_ptr.vmem [resolvable:$true] %s201_s1 }
   0xe   :  { %v82_v5 = vpack.c.bf16 %v405_v4, %v401_v2  ;;  %v411_v7 = vld [vmem:[#allocation5 + $0x58] sm:$0xff]  ;;  %v415_v9 = vld [vmem:[#allocation5 + $0x40] sm:$0xff]  ;;  %v417_v10 = vld [vmem:[#allocation5 + $0x48] sm:$0xff] }
   0xf   :  { %132 = vmatpush.bf16.msra.mxu0 %v83_v3  ;;  %257 = vmatpush.bf16.msra.mxu1 %v83_v3  ;;  %v81_v8 = vpack.c.bf16 %v411_v7, %v409_v6  ;;  %v80_v11 = vpack.c.bf16 %v417_v10, %v415_v9  ;;  %v421_v12 = vld [vmem:[#allocation5 + $0x30] sm:$0xff]  ;;  %v423_v13 = vld [vmem:[#allocation5 + $0x38] sm:$0xff]  ;;  %v48_v15 = vld [vmem:[#allocation5 + $0x20] sm:$0xff] }
  0x10   :  { %258 = vmatpush.bf16.msra.mxu2 %v83_v3  ;;  %259 = vmatpush.bf16.msra.mxu3 %v83_v3  ;;  %v79_v14 = vpack.c.bf16 %v423_v13, %v421_v12  ;;  %v49_v16 = vld [vmem:[#allocation5 + $0x28] sm:$0xff]  ;;  %v46_v18 = vld [vmem:[#allocation5 + $0x10] sm:$0xff]  ;;  %v427_v19 = vld [vmem:[#allocation5 + $0x18] sm:$0xff] }
  0x11   :  { %v78_v17 = vpack.c.bf16 %v49_v16, %v48_v15  ;;  %v77_v20 = vpack.c.bf16 %v427_v19, %v46_v18  ;;  %v44_v21 = vld [vmem:[#allocation5] sm:$0xff]  ;;  %v45_v22 = vld [vmem:[#allocation5 + $0x8] sm:$0xff]  ;;  %v251_v25 = vld [vmem:[#allocation2 + $0x10] sm:$0xff] }
  0x12   :  { %v76_v23 = vpack.c.bf16 %v45_v22, %v44_v21  ;;  %v249_v24 = vld [vmem:[#allocation2] sm:$0xff]  ;;  %v255_v27 = vld [vmem:[#allocation2 + $0x30] sm:$0xff]  ;;  %v250_v28 = vld [vmem:[#allocation2 + $0x8] sm:$0xff] }
  0x13   :  { %133 = vmatpush.bf16.msra.mxu0 %v82_v5  ;;  %260 = vmatpush.bf16.msra.mxu1 %v82_v5  ;;  %v253_v26 = vld [vmem:[#allocation2 + $0x20] sm:$0xff]  ;;  %v252_v29 = vld [vmem:[#allocation2 + $0x18] sm:$0xff]  ;;  %v254_v30 = vld [vmem:[#allocation2 + $0x28] sm:$0xff] }
  0x14   :  { %261 = vmatpush.bf16.msra.mxu2 %v82_v5  ;;  %262 = vmatpush.bf16.msra.mxu3 %v82_v5  ;;  %v256_v31 = vld [vmem:[#allocation2 + $0x38] sm:$0xff] }
  0x17   :  { %134 = vmatpush.bf16.msra.mxu0 %v81_v8  ;;  %263 = vmatpush.bf16.msra.mxu1 %v81_v8 }
  0x18   :  { %264 = vmatpush.bf16.msra.mxu2 %v81_v8  ;;  %265 = vmatpush.bf16.msra.mxu3 %v81_v8 }
  0x1b   :  { %135 = vmatpush.bf16.msra.mxu0 %v80_v11  ;;  %266 = vmatpush.bf16.msra.mxu1 %v80_v11 }
  0x1c   :  { %267 = vmatpush.bf16.msra.mxu2 %v80_v11  ;;  %268 = vmatpush.bf16.msra.mxu3 %v80_v11 }
  0x1f   :  { %136 = vmatpush.bf16.msra.mxu0 %v79_v14  ;;  %269 = vmatpush.bf16.msra.mxu1 %v79_v14 }
  0x20   :  { %270 = vmatpush.bf16.msra.mxu2 %v79_v14  ;;  %271 = vmatpush.bf16.msra.mxu3 %v79_v14 }
  0x23   :  { %137 = vmatpush.bf16.msra.mxu0 %v78_v17  ;;  %272 = vmatpush.bf16.msra.mxu1 %v78_v17 }
  0x24   :  { %273 = vmatpush.bf16.msra.mxu2 %v78_v17  ;;  %274 = vmatpush.bf16.msra.mxu3 %v78_v17 }
  0x27   :  { %138 = vmatpush.bf16.msra.mxu0 %v77_v20  ;;  %275 = vmatpush.bf16.msra.mxu1 %v77_v20 }
  0x28   :  { %276 = vmatpush.bf16.msra.mxu2 %v77_v20  ;;  %277 = vmatpush.bf16.msra.mxu3 %v77_v20 }
  0x2b   :  { %139 = vmatpush.bf16.msra.mxu0 %v76_v23  ;;  %278 = vmatpush.bf16.msra.mxu1 %v76_v23 }
  0x2c   :  { %279 = vmatpush.bf16.msra.mxu2 %v76_v23  ;;  %280 = vmatpush.bf16.msra.mxu3 %v76_v23 }
  0x2e   :  { %140 = vmatmul.bf16.vlgmr.msra.gmra.mxu0 %v249_v24  ;;  %150 = vmatmul.bf16.vlgmr.msra.gmra.mxu1 %v251_v25 }
  0x2f   :  { %160 = vmatmul.bf16.vlgmr.msra.gmra.mxu2 %v253_v26  ;;  %170 = vmatmul.bf16.vlgmr.msra.gmra.mxu3 %v255_v27 }
  0x3e   :  { %145 = vmatmul.bf16.gmra.mxu0 %v250_v28  ;;  %155 = vmatmul.bf16.gmra.mxu1 %v252_v29 }
  0x3f   :  { %165 = vmatmul.bf16.gmra.mxu2 %v254_v30  ;;  %175 = vmatmul.bf16.gmra.mxu3 %v256_v31 }
  0xab   :  { %v141_v32 = vpop.f32.mrf.mxu0  ;;  %v151_v33 = vpop.f32.mrf.mxu1 }
  0xac   :  { %v142_v34 = vadd.f32 %v141_v32, %v44_v21  ;;  %v152_v35 = vadd.f32 %v151_v33, %v48_v15 }
  0xae   :  { %181 = vst [vmem:[#allocation7] sm:$0xff] %v142_v34 }
  0xaf   :  { %185 = vst [vmem:[#allocation7 + $0x20] sm:$0xff] %v152_v35 }
  0xb2   :  { %v161_v36 = vpop.f32.mrf.mxu2  ;;  %v171_v37 = vpop.f32.mrf.mxu3 }
  0xb3   :  { %v162_v38 = vadd.f32 %v161_v36, %v415_v9  ;;  %v172_v39 = vadd.f32 %v171_v37, %v401_v2  ;;  %v143_v40 = vpop.f32.mrf.mxu0  ;;  %v153_v41 = vpop.f32.mrf.mxu1 }
  0xb4   :  { %v144_v42 = vadd.f32 %v143_v40, %v45_v22  ;;  %v154_v43 = vadd.f32 %v153_v41, %v49_v16 }
  0xb5   :  { %189 = vst [vmem:[#allocation7 + $0x40] sm:$0xff] %v162_v38 }
  0xb6   :  { %193 = vst [vmem:[#allocation7 + $0x60] sm:$0xff] %v172_v39 }
  0xb7   :  { %182 = vst [vmem:[#allocation7 + $0x8] sm:$0xff] %v144_v42 }
  0xb8   :  { %186 = vst [vmem:[#allocation7 + $0x28] sm:$0xff] %v154_v43 }
  0xba   :  { %v163_v44 = vpop.f32.mrf.mxu2  ;;  %v173_v45 = vpop.f32.mrf.mxu3 }
  0xbb   :  { %v164_v46 = vadd.f32 %v163_v44, %v417_v10  ;;  %v174_v47 = vadd.f32 %v173_v45, %v405_v4  ;;  %v146_v48 = vpop.f32.mrf.mxu0  ;;  %v156_v49 = vpop.f32.mrf.mxu1 }
  0xbc   :  { %v147_v50 = vadd.f32 %v146_v48, %v46_v18  ;;  %v157_v51 = vadd.f32 %v156_v49, %v421_v12 }
  0xbd   :  { %190 = vst [vmem:[#allocation7 + $0x48] sm:$0xff] %v164_v46 }
  0xbe   :  { %194 = vst [vmem:[#allocation7 + $0x68] sm:$0xff] %v174_v47 }
  0xbf   :  { %183 = vst [vmem:[#allocation7 + $0x10] sm:$0xff] %v147_v50 }
  0xc0   :  { %187 = vst [vmem:[#allocation7 + $0x30] sm:$0xff] %v157_v51 }
  0xc2   :  { %v166_v52 = vpop.f32.mrf.mxu2  ;;  %v176_v53 = vpop.f32.mrf.mxu3 }
  0xc3   :  { %v167_v54 = vadd.f32 %v166_v52, %v409_v6  ;;  %v177_v55 = vadd.f32 %v176_v53, %v397_v0  ;;  %v148_v56 = vpop.f32.mrf.mxu0  ;;  %v158_v57 = vpop.f32.mrf.mxu1 }
  0xc4   :  { %v149_v58 = vadd.f32 %v148_v56, %v427_v19  ;;  %v159_v59 = vadd.f32 %v158_v57, %v423_v13 }
  0xc5   :  { %191 = vst [vmem:[#allocation7 + $0x50] sm:$0xff] %v167_v54 }
  0xc6   :  { %195 = vst [vmem:[#allocation7 + $0x70] sm:$0xff] %v177_v55 }
  0xc7   :  { %184 = vst [vmem:[#allocation7 + $0x18] sm:$0xff] %v149_v58 }
  0xc8   :  { %188 = vst [vmem:[#allocation7 + $0x38] sm:$0xff] %v159_v59 }
  0xca   :  { %v168_v60 = vpop.f32.mrf.mxu2  ;;  %v178_v61 = vpop.f32.mrf.mxu3 }
  0xcb   :  { %v169_v62 = vadd.f32 %v168_v60, %v411_v7  ;;  %v179_v63 = vadd.f32 %v178_v61, %v399_v1 }
  0xcd   :  { %192 = vst [vmem:[#allocation7 + $0x58] sm:$0xff] %v169_v62 }
  0xce   :  { %196 = vst [vmem:[#allocation7 + $0x78] sm:$0xff] %v179_v63 }
  0xcf   :  { %209 = dma.vmem_to_hbm [thread:$0]  %s202_s1, 2048, %s204_s25, [#allocation4], %s370_s21, %s370_s21, %s371_s22  }
  0xd0   :  { %364 = dma.done.wait [#allocation4], 2048  }
  0xd1   :  { %365 = vsyncadd [#allocation4], 4294965248 }
  0xd2   :  { %214 = vsyncpa [#allocation3], 1 }
  0xd3   :  { %215 = vsyncpa [#allocation6], 1 }
  0xd4   :  { %216 = vsyncpa [#allocation4], 1 }

</bundles_post_ra>
